<compile_context>
chip_gen: v6e
topology: v6e:2x2x1
jax: 0.10.0
libtpu: 0.0.40
codegen_flags: <defaults>
</compile_context>

<pallas_src>
import jax
import jax.numpy as jnp
from jax.experimental import pallas as pl
from jax.experimental.pallas import tpu as pltpu


def _lstm_kernel(x_ref, wi_ref, wh_ref, b_ref, wl_ref, bl_ref, out_ref):
    T, Bp, F = x_ref.shape
    H = wh_ref.shape[0]

    # ---- hoisted input projection: one MXU matmul for all T time steps ----
    x_flat = x_ref[...].reshape(T * Bp, F)                          # (T*Bp, F)
    gx = jnp.dot(x_flat, wi_ref[...],
                 preferred_element_type=jnp.float32) + b_ref[...]   # (T*Bp, 4H)
    gx = gx.reshape(T, Bp, 4 * H)        # traced value -> stays in vregs

    wh = wh_ref[...]                     # (H, 4H), loaded once, loop-invariant

    h = jnp.zeros((Bp, H), jnp.float32)
    c = jnp.zeros((Bp, H), jnp.float32)

    # ---- recurrence: static unroll over T (small, fixed) ----
    # Gate order after the wrapper's column permutation is [i, f, o, g]:
    # sigmoid over one contiguous (Bp, 3H) slice, tanh only over the g slice.
    for t in range(T):
        gates = gx[t] + jnp.dot(h, wh, preferred_element_type=jnp.float32)
        sig = jax.nn.sigmoid(gates[:, :3 * H])       # (Bp, 3H) -> i, f, o
        g_g = jnp.tanh(gates[:, 3 * H:])             # (Bp,  H) -> g
        i_g = sig[:, 0 * H:1 * H]
        f_g = sig[:, 1 * H:2 * H]
        o_g = sig[:, 2 * H:3 * H]
        c = f_g * c + i_g * g_g
        h = o_g * jnp.tanh(c)

    # ---- head: relu -> linear(H -> 1) -> sigmoid (VPU mul + lane reduce) ----
    hr = jnp.maximum(h, 0.0)                                        # (Bp, H)
    y = jnp.sum(hr * wl_ref[...], axis=-1, keepdims=True) + bl_ref[...]  # (Bp, 1)
    out_ref[...] = jax.nn.sigmoid(y).astype(out_ref.dtype)


def _reorder_gate_columns(a, H):
    """Permute the last (4H) axis from PyTorch order [i, f, g, o] to [i, f, o, g]."""
    i, f, g, o = jnp.split(a, 4, axis=-1)
    return jnp.concatenate([i, f, o, g], axis=-1)


def movement_lstm_forward(x, params):
    """x: (B, T, F) float32 (PyTorch batch_first).  Returns (B,) float32."""
    B, T, F = x.shape
    H = params["w_hh"].shape[0]          # w_hh stored as (H, 4H)

    # pad batch to the f32 sublane quantum (8) so vector ops are unmasked
    B_pad = max(8, ((B + 7) // 8) * 8)
    x_tm = jnp.transpose(x, (1, 0, 2))   # (T, B, F) time-major
    if B_pad != B:
        x_tm = jnp.pad(x_tm, ((0, 0), (0, B_pad - B), (0, 0)))

    # param prep: gate-column reorder to [i, f, o, g], fused bias, (1, H) head
    wi = _reorder_gate_columns(params["w_ih"], H)                       # (F, 4H)
    wh = _reorder_gate_columns(params["w_hh"], H)                       # (H, 4H)
    b = _reorder_gate_columns(
        (params["b_ih"] + params["b_hh"]).reshape(1, 4 * H), H)         # (1, 4H)
    wl = params["w_lin"].reshape(1, H)                                  # (1, H)
    bl = params["b_lin"].reshape(1, 1)                                  # (1, 1)

    out = pl.pallas_call(
        _lstm_kernel,
        out_shape=jax.ShapeDtypeStruct((B_pad, 1), jnp.float32),
        grid=(1,),
        in_specs=[
            pl.BlockSpec((T, B_pad, F), lambda i: (0, 0, 0)),  # x (time-major)
            pl.BlockSpec((F, 4 * H), lambda i: (0, 0)),        # W_ih^T  [i,f,o,g]
            pl.BlockSpec((H, 4 * H), lambda i: (0, 0)),        # W_hh^T  [i,f,o,g]
            pl.BlockSpec((1, 4 * H), lambda i: (0, 0)),        # b_ih + b_hh
            pl.BlockSpec((1, H), lambda i: (0, 0)),            # W_lin (row)
            pl.BlockSpec((1, 1), lambda i: (0, 0)),            # b_lin
        ],
        out_specs=pl.BlockSpec((B_pad, 1), lambda i: (0, 0)),
        compiler_params=pltpu.CompilerParams(
            dimension_semantics=("arbitrary",)),  # single serial step
    )(x_tm, wi, wh, b, wl, bl)

    return out[:B, 0]   # drop batch padding, flatten -> (B,)


def init_params(key, num_features, hidden_units):
    """Deterministic init matching PyTorch LSTM/Linear parameter shapes.

    Stored pre-transposed for matmul convenience, in PyTorch gate order
    [i, f, g, o]; the kernel wrapper permutes the columns to [i, f, o, g].
    """
    F, H = num_features, hidden_units
    k = 1.0 / jnp.sqrt(jnp.float32(H))
    ks = jax.random.split(key, 6)
    w_ih = jax.random.uniform(ks[0], (F, 4 * H), jnp.float32, -k, k)
    w_hh = jax.random.uniform(ks[1], (H, 4 * H), jnp.float32, -k, k)
    b_ih = jax.random.uniform(ks[2], (4 * H,), jnp.float32, -k, k)
    b_hh = jax.random.uniform(ks[3], (4 * H,), jnp.float32, -k, k)
    w_lin = jax.random.uniform(ks[4], (H, 1), jnp.float32, -k, k)
    b_lin = jax.random.uniform(ks[5], (1,), jnp.float32, -k, k)
    return dict(w_ih=w_ih, w_hh=w_hh, b_ih=b_ih, b_hh=b_hh,
                w_lin=w_lin, b_lin=b_lin)


def reference_forward(x, params):
    """Pure-JAX reference (lax.scan) replicating the PyTorch forward."""
    B, T, F = x.shape
    H = params["w_hh"].shape[0]
    b = params["b_ih"] + params["b_hh"]

    def step(carry, x_t):
        h, c = carry
        gates = x_t @ params["w_ih"] + h @ params["w_hh"] + b
        i = jax.nn.sigmoid(gates[:, 0 * H:1 * H])
        f = jax.nn.sigmoid(gates[:, 1 * H:2 * H])
        g = jnp.tanh(gates[:, 2 * H:3 * H])
        o = jax.nn.sigmoid(gates[:, 3 * H:4 * H])
        c = f * c + i * g
        h = o * jnp.tanh(c)
        return (h, c), None

    h0 = jnp.zeros((B, H), jnp.float32)
    c0 = jnp.zeros((B, H), jnp.float32)
    (hn, _), _ = jax.lax.scan(step, (h0, c0), jnp.transpose(x, (1, 0, 2)))
    out = jnp.maximum(hn, 0.0) @ params["w_lin"] + params["b_lin"]
    return jax.nn.sigmoid(out.reshape(-1))


if __name__ == "__main__":
    B, T, F, H = 2, 8, 4, 32   # batch, seq, num_features, hidden_units

    key = jax.random.PRNGKey(0)
    k_x, k_p = jax.random.split(key)
    x = jax.random.normal(k_x, (B, T, F), jnp.float32)
    params = init_params(k_p, F, H)

    out = movement_lstm_forward(x, params)
    out = jax.block_until_ready(out)

    ref = reference_forward(x, params)
    assert out.shape == (B,)
    assert jnp.allclose(out, ref, atol=1e-5, rtol=1e-5), (out, ref)

    print("KERNEL_OK")
</pallas_src>

<mosaic_0001>
module attributes {stable_mosaic.version = 11 : i64} {
  func.func @_lstm_kernel(%arg0: i32, %arg1: memref<8x8x4xf32, #tpu.memory_space<vmem>>, %arg2: memref<4x128xf32, #tpu.memory_space<vmem>>, %arg3: memref<32x128xf32, #tpu.memory_space<vmem>>, %arg4: memref<1x128xf32, #tpu.memory_space<vmem>>, %arg5: memref<1x32xf32, #tpu.memory_space<vmem>>, %arg6: memref<1x1xf32, #tpu.memory_space<vmem>>, %arg7: memref<8x1xf32, #tpu.memory_space<vmem>>) attributes {dimension_semantics = [#tpu.dimension_semantics<arbitrary>], iteration_bounds = array<i64: 1>, scalar_prefetch = 0 : i64, scratch_operands = 0 : i64, tpu.core_type = #tpu.core_type<tc>, window_params = [{pipeline_mode = #tpu.pipeline_mode<synchronous>, transform_indices = @transform_0, window_bounds = array<i64: 8, 8, 4>}, {pipeline_mode = #tpu.pipeline_mode<synchronous>, transform_indices = @transform_1, window_bounds = array<i64: 4, 128>}, {pipeline_mode = #tpu.pipeline_mode<synchronous>, transform_indices = @transform_2, window_bounds = array<i64: 32, 128>}, {pipeline_mode = #tpu.pipeline_mode<synchronous>, transform_indices = @transform_3, window_bounds = array<i64: 1, 128>}, {pipeline_mode = #tpu.pipeline_mode<synchronous>, transform_indices = @transform_4, window_bounds = array<i64: 1, 32>}, {pipeline_mode = #tpu.pipeline_mode<synchronous>, transform_indices = @transform_5, window_bounds = array<i64: 1, 1>}, {pipeline_mode = #tpu.pipeline_mode<synchronous>, transform_indices = @transform_6, window_bounds = array<i64: 8, 1>}]} {
    %c0 = arith.constant 0 : index
    %c0_0 = arith.constant 0 : index
    %c0_1 = arith.constant 0 : index
    %0 = vector.load %arg1[%c0, %c0_0, %c0_1] : memref<8x8x4xf32, #tpu.memory_space<vmem>>, vector<8x8x4xf32>
    %1 = vector.shape_cast %0 : vector<8x8x4xf32> to vector<64x4xf32>
    %c0_2 = arith.constant 0 : index
    %c0_3 = arith.constant 0 : index
    %2 = vector.load %arg2[%c0_2, %c0_3] : memref<4x128xf32, #tpu.memory_space<vmem>>, vector<4x128xf32>
    %cst = arith.constant dense<0.000000e+00> : vector<64x128xf32>
    %3 = tpu.matmul %1, %2, %cst {dimension_numbers = #tpu.dot_dimension_numbers<[1], [0], [0], [1], [0, 0, 1, 1], [], []>} : vector<64x4xf32>, vector<4x128xf32>, vector<64x128xf32> -> vector<64x128xf32>
    %c0_4 = arith.constant 0 : index
    %c0_5 = arith.constant 0 : index
    %4 = vector.load %arg4[%c0_4, %c0_5] : memref<1x128xf32, #tpu.memory_space<vmem>>, vector<1x128xf32>
    %5 = vector.broadcast %4 : vector<1x128xf32> to vector<64x128xf32>
    %6 = arith.addf %3, %5 : vector<64x128xf32>
    %7 = vector.shape_cast %6 : vector<64x128xf32> to vector<8x8x128xf32>
    %c0_6 = arith.constant 0 : index
    %c0_7 = arith.constant 0 : index
    %8 = vector.load %arg3[%c0_6, %c0_7] : memref<32x128xf32, #tpu.memory_space<vmem>>, vector<32x128xf32>
    %cst_8 = arith.constant 0.000000e+00 : f32
    %9 = vector.broadcast %cst_8 : f32 to vector<8x32xf32>
    %cst_9 = arith.constant 0.000000e+00 : f32
    %10 = vector.broadcast %cst_9 : f32 to vector<8x32xf32>
    %11 = vector.extract_strided_slice %7 {offsets = [0, 0, 0], sizes = [1, 8, 128], strides = [1, 1, 1]} : vector<8x8x128xf32> to vector<1x8x128xf32>
    %12 = vector.shape_cast %11 : vector<1x8x128xf32> to vector<8x128xf32>
    %cst_10 = arith.constant dense<0.000000e+00> : vector<8x128xf32>
    %13 = tpu.matmul %9, %8, %cst_10 {dimension_numbers = #tpu.dot_dimension_numbers<[1], [0], [0], [1], [0, 0, 1, 1], [], []>} : vector<8x32xf32>, vector<32x128xf32>, vector<8x128xf32> -> vector<8x128xf32>
    %14 = arith.addf %12, %13 : vector<8x128xf32>
    %15 = vector.extract_strided_slice %14 {offsets = [0, 0], sizes = [8, 96], strides = [1, 1]} : vector<8x128xf32> to vector<8x96xf32>
    %16 = arith.negf %15 : vector<8x96xf32>
    %17 = math.exp %16 : vector<8x96xf32>
    %cst_11 = arith.constant 1.000000e+00 : f32
    %18 = vector.broadcast %cst_11 : f32 to vector<8x96xf32>
    %19 = arith.addf %18, %17 : vector<8x96xf32>
    %20 = arith.divf %18, %19 : vector<8x96xf32>
    %21 = vector.extract_strided_slice %14 {offsets = [0, 96], sizes = [8, 32], strides = [1, 1]} : vector<8x128xf32> to vector<8x32xf32>
    %22 = math.tanh %21 : vector<8x32xf32>
    %23 = vector.extract_strided_slice %20 {offsets = [0, 0], sizes = [8, 32], strides = [1, 1]} : vector<8x96xf32> to vector<8x32xf32>
    %24 = vector.extract_strided_slice %20 {offsets = [0, 32], sizes = [8, 32], strides = [1, 1]} : vector<8x96xf32> to vector<8x32xf32>
    %25 = vector.extract_strided_slice %20 {offsets = [0, 64], sizes = [8, 32], strides = [1, 1]} : vector<8x96xf32> to vector<8x32xf32>
    %26 = arith.mulf %24, %10 : vector<8x32xf32>
    %27 = arith.mulf %23, %22 : vector<8x32xf32>
    %28 = arith.addf %26, %27 : vector<8x32xf32>
    %29 = math.tanh %28 : vector<8x32xf32>
    %30 = arith.mulf %25, %29 : vector<8x32xf32>
    %31 = vector.extract_strided_slice %7 {offsets = [1, 0, 0], sizes = [1, 8, 128], strides = [1, 1, 1]} : vector<8x8x128xf32> to vector<1x8x128xf32>
    %32 = vector.shape_cast %31 : vector<1x8x128xf32> to vector<8x128xf32>
    %cst_12 = arith.constant dense<0.000000e+00> : vector<8x128xf32>
    %33 = tpu.matmul %30, %8, %cst_12 {dimension_numbers = #tpu.dot_dimension_numbers<[1], [0], [0], [1], [0, 0, 1, 1], [], []>} : vector<8x32xf32>, vector<32x128xf32>, vector<8x128xf32> -> vector<8x128xf32>
    %34 = arith.addf %32, %33 : vector<8x128xf32>
    %35 = vector.extract_strided_slice %34 {offsets = [0, 0], sizes = [8, 96], strides = [1, 1]} : vector<8x128xf32> to vector<8x96xf32>
    %36 = arith.negf %35 : vector<8x96xf32>
    %37 = math.exp %36 : vector<8x96xf32>
    %cst_13 = arith.constant 1.000000e+00 : f32
    %38 = vector.broadcast %cst_13 : f32 to vector<8x96xf32>
    %39 = arith.addf %38, %37 : vector<8x96xf32>
    %40 = arith.divf %38, %39 : vector<8x96xf32>
    %41 = vector.extract_strided_slice %34 {offsets = [0, 96], sizes = [8, 32], strides = [1, 1]} : vector<8x128xf32> to vector<8x32xf32>
    %42 = math.tanh %41 : vector<8x32xf32>
    %43 = vector.extract_strided_slice %40 {offsets = [0, 0], sizes = [8, 32], strides = [1, 1]} : vector<8x96xf32> to vector<8x32xf32>
    %44 = vector.extract_strided_slice %40 {offsets = [0, 32], sizes = [8, 32], strides = [1, 1]} : vector<8x96xf32> to vector<8x32xf32>
    %45 = vector.extract_strided_slice %40 {offsets = [0, 64], sizes = [8, 32], strides = [1, 1]} : vector<8x96xf32> to vector<8x32xf32>
    %46 = arith.mulf %44, %28 : vector<8x32xf32>
    %47 = arith.mulf %43, %42 : vector<8x32xf32>
    %48 = arith.addf %46, %47 : vector<8x32xf32>
    %49 = math.tanh %48 : vector<8x32xf32>
    %50 = arith.mulf %45, %49 : vector<8x32xf32>
    %51 = vector.extract_strided_slice %7 {offsets = [2, 0, 0], sizes = [1, 8, 128], strides = [1, 1, 1]} : vector<8x8x128xf32> to vector<1x8x128xf32>
    %52 = vector.shape_cast %51 : vector<1x8x128xf32> to vector<8x128xf32>
    %cst_14 = arith.constant dense<0.000000e+00> : vector<8x128xf32>
    %53 = tpu.matmul %50, %8, %cst_14 {dimension_numbers = #tpu.dot_dimension_numbers<[1], [0], [0], [1], [0, 0, 1, 1], [], []>} : vector<8x32xf32>, vector<32x128xf32>, vector<8x128xf32> -> vector<8x128xf32>
    %54 = arith.addf %52, %53 : vector<8x128xf32>
    %55 = vector.extract_strided_slice %54 {offsets = [0, 0], sizes = [8, 96], strides = [1, 1]} : vector<8x128xf32> to vector<8x96xf32>
    %56 = arith.negf %55 : vector<8x96xf32>
    %57 = math.exp %56 : vector<8x96xf32>
    %cst_15 = arith.constant 1.000000e+00 : f32
    %58 = vector.broadcast %cst_15 : f32 to vector<8x96xf32>
    %59 = arith.addf %58, %57 : vector<8x96xf32>
    %60 = arith.divf %58, %59 : vector<8x96xf32>
    %61 = vector.extract_strided_slice %54 {offsets = [0, 96], sizes = [8, 32], strides = [1, 1]} : vector<8x128xf32> to vector<8x32xf32>
    %62 = math.tanh %61 : vector<8x32xf32>
    %63 = vector.extract_strided_slice %60 {offsets = [0, 0], sizes = [8, 32], strides = [1, 1]} : vector<8x96xf32> to vector<8x32xf32>
    %64 = vector.extract_strided_slice %60 {offsets = [0, 32], sizes = [8, 32], strides = [1, 1]} : vector<8x96xf32> to vector<8x32xf32>
    %65 = vector.extract_strided_slice %60 {offsets = [0, 64], sizes = [8, 32], strides = [1, 1]} : vector<8x96xf32> to vector<8x32xf32>
    %66 = arith.mulf %64, %48 : vector<8x32xf32>
    %67 = arith.mulf %63, %62 : vector<8x32xf32>
    %68 = arith.addf %66, %67 : vector<8x32xf32>
    %69 = math.tanh %68 : vector<8x32xf32>
    %70 = arith.mulf %65, %69 : vector<8x32xf32>
    %71 = vector.extract_strided_slice %7 {offsets = [3, 0, 0], sizes = [1, 8, 128], strides = [1, 1, 1]} : vector<8x8x128xf32> to vector<1x8x128xf32>
    %72 = vector.shape_cast %71 : vector<1x8x128xf32> to vector<8x128xf32>
    %cst_16 = arith.constant dense<0.000000e+00> : vector<8x128xf32>
    %73 = tpu.matmul %70, %8, %cst_16 {dimension_numbers = #tpu.dot_dimension_numbers<[1], [0], [0], [1], [0, 0, 1, 1], [], []>} : vector<8x32xf32>, vector<32x128xf32>, vector<8x128xf32> -> vector<8x128xf32>
    %74 = arith.addf %72, %73 : vector<8x128xf32>
    %75 = vector.extract_strided_slice %74 {offsets = [0, 0], sizes = [8, 96], strides = [1, 1]} : vector<8x128xf32> to vector<8x96xf32>
    %76 = arith.negf %75 : vector<8x96xf32>
    %77 = math.exp %76 : vector<8x96xf32>
    %cst_17 = arith.constant 1.000000e+00 : f32
    %78 = vector.broadcast %cst_17 : f32 to vector<8x96xf32>
    %79 = arith.addf %78, %77 : vector<8x96xf32>
    %80 = arith.divf %78, %79 : vector<8x96xf32>
    %81 = vector.extract_strided_slice %74 {offsets = [0, 96], sizes = [8, 32], strides = [1, 1]} : vector<8x128xf32> to vector<8x32xf32>
    %82 = math.tanh %81 : vector<8x32xf32>
    %83 = vector.extract_strided_slice %80 {offsets = [0, 0], sizes = [8, 32], strides = [1, 1]} : vector<8x96xf32> to vector<8x32xf32>
    %84 = vector.extract_strided_slice %80 {offsets = [0, 32], sizes = [8, 32], strides = [1, 1]} : vector<8x96xf32> to vector<8x32xf32>
    %85 = vector.extract_strided_slice %80 {offsets = [0, 64], sizes = [8, 32], strides = [1, 1]} : vector<8x96xf32> to vector<8x32xf32>
    %86 = arith.mulf %84, %68 : vector<8x32xf32>
    %87 = arith.mulf %83, %82 : vector<8x32xf32>
    %88 = arith.addf %86, %87 : vector<8x32xf32>
    %89 = math.tanh %88 : vector<8x32xf32>
    %90 = arith.mulf %85, %89 : vector<8x32xf32>
    %91 = vector.extract_strided_slice %7 {offsets = [4, 0, 0], sizes = [1, 8, 128], strides = [1, 1, 1]} : vector<8x8x128xf32> to vector<1x8x128xf32>
    %92 = vector.shape_cast %91 : vector<1x8x128xf32> to vector<8x128xf32>
    %cst_18 = arith.constant dense<0.000000e+00> : vector<8x128xf32>
    %93 = tpu.matmul %90, %8, %cst_18 {dimension_numbers = #tpu.dot_dimension_numbers<[1], [0], [0], [1], [0, 0, 1, 1], [], []>} : vector<8x32xf32>, vector<32x128xf32>, vector<8x128xf32> -> vector<8x128xf32>
    %94 = arith.addf %92, %93 : vector<8x128xf32>
    %95 = vector.extract_strided_slice %94 {offsets = [0, 0], sizes = [8, 96], strides = [1, 1]} : vector<8x128xf32> to vector<8x96xf32>
    %96 = arith.negf %95 : vector<8x96xf32>
    %97 = math.exp %96 : vector<8x96xf32>
    %cst_19 = arith.constant 1.000000e+00 : f32
    %98 = vector.broadcast %cst_19 : f32 to vector<8x96xf32>
    %99 = arith.addf %98, %97 : vector<8x96xf32>
    %100 = arith.divf %98, %99 : vector<8x96xf32>
    %101 = vector.extract_strided_slice %94 {offsets = [0, 96], sizes = [8, 32], strides = [1, 1]} : vector<8x128xf32> to vector<8x32xf32>
    %102 = math.tanh %101 : vector<8x32xf32>
    %103 = vector.extract_strided_slice %100 {offsets = [0, 0], sizes = [8, 32], strides = [1, 1]} : vector<8x96xf32> to vector<8x32xf32>
    %104 = vector.extract_strided_slice %100 {offsets = [0, 32], sizes = [8, 32], strides = [1, 1]} : vector<8x96xf32> to vector<8x32xf32>
    %105 = vector.extract_strided_slice %100 {offsets = [0, 64], sizes = [8, 32], strides = [1, 1]} : vector<8x96xf32> to vector<8x32xf32>
    %106 = arith.mulf %104, %88 : vector<8x32xf32>
    %107 = arith.mulf %103, %102 : vector<8x32xf32>
    %108 = arith.addf %106, %107 : vector<8x32xf32>
    %109 = math.tanh %108 : vector<8x32xf32>
    %110 = arith.mulf %105, %109 : vector<8x32xf32>
    %111 = vector.extract_strided_slice %7 {offsets = [5, 0, 0], sizes = [1, 8, 128], strides = [1, 1, 1]} : vector<8x8x128xf32> to vector<1x8x128xf32>
    %112 = vector.shape_cast %111 : vector<1x8x128xf32> to vector<8x128xf32>
    %cst_20 = arith.constant dense<0.000000e+00> : vector<8x128xf32>
    %113 = tpu.matmul %110, %8, %cst_20 {dimension_numbers = #tpu.dot_dimension_numbers<[1], [0], [0], [1], [0, 0, 1, 1], [], []>} : vector<8x32xf32>, vector<32x128xf32>, vector<8x128xf32> -> vector<8x128xf32>
    %114 = arith.addf %112, %113 : vector<8x128xf32>
    %115 = vector.extract_strided_slice %114 {offsets = [0, 0], sizes = [8, 96], strides = [1, 1]} : vector<8x128xf32> to vector<8x96xf32>
    %116 = arith.negf %115 : vector<8x96xf32>
    %117 = math.exp %116 : vector<8x96xf32>
    %cst_21 = arith.constant 1.000000e+00 : f32
    %118 = vector.broadcast %cst_21 : f32 to vector<8x96xf32>
    %119 = arith.addf %118, %117 : vector<8x96xf32>
    %120 = arith.divf %118, %119 : vector<8x96xf32>
    %121 = vector.extract_strided_slice %114 {offsets = [0, 96], sizes = [8, 32], strides = [1, 1]} : vector<8x128xf32> to vector<8x32xf32>
    %122 = math.tanh %121 : vector<8x32xf32>
    %123 = vector.extract_strided_slice %120 {offsets = [0, 0], sizes = [8, 32], strides = [1, 1]} : vector<8x96xf32> to vector<8x32xf32>
    %124 = vector.extract_strided_slice %120 {offsets = [0, 32], sizes = [8, 32], strides = [1, 1]} : vector<8x96xf32> to vector<8x32xf32>
    %125 = vector.extract_strided_slice %120 {offsets = [0, 64], sizes = [8, 32], strides = [1, 1]} : vector<8x96xf32> to vector<8x32xf32>
    %126 = arith.mulf %124, %108 : vector<8x32xf32>
    %127 = arith.mulf %123, %122 : vector<8x32xf32>
    %128 = arith.addf %126, %127 : vector<8x32xf32>
    %129 = math.tanh %128 : vector<8x32xf32>
    %130 = arith.mulf %125, %129 : vector<8x32xf32>
    %131 = vector.extract_strided_slice %7 {offsets = [6, 0, 0], sizes = [1, 8, 128], strides = [1, 1, 1]} : vector<8x8x128xf32> to vector<1x8x128xf32>
    %132 = vector.shape_cast %131 : vector<1x8x128xf32> to vector<8x128xf32>
    %cst_22 = arith.constant dense<0.000000e+00> : vector<8x128xf32>
    %133 = tpu.matmul %130, %8, %cst_22 {dimension_numbers = #tpu.dot_dimension_numbers<[1], [0], [0], [1], [0, 0, 1, 1], [], []>} : vector<8x32xf32>, vector<32x128xf32>, vector<8x128xf32> -> vector<8x128xf32>
    %134 = arith.addf %132, %133 : vector<8x128xf32>
    %135 = vector.extract_strided_slice %134 {offsets = [0, 0], sizes = [8, 96], strides = [1, 1]} : vector<8x128xf32> to vector<8x96xf32>
    %136 = arith.negf %135 : vector<8x96xf32>
    %137 = math.exp %136 : vector<8x96xf32>
    %cst_23 = arith.constant 1.000000e+00 : f32
    %138 = vector.broadcast %cst_23 : f32 to vector<8x96xf32>
    %139 = arith.addf %138, %137 : vector<8x96xf32>
    %140 = arith.divf %138, %139 : vector<8x96xf32>
    %141 = vector.extract_strided_slice %134 {offsets = [0, 96], sizes = [8, 32], strides = [1, 1]} : vector<8x128xf32> to vector<8x32xf32>
    %142 = math.tanh %141 : vector<8x32xf32>
    %143 = vector.extract_strided_slice %140 {offsets = [0, 0], sizes = [8, 32], strides = [1, 1]} : vector<8x96xf32> to vector<8x32xf32>
    %144 = vector.extract_strided_slice %140 {offsets = [0, 32], sizes = [8, 32], strides = [1, 1]} : vector<8x96xf32> to vector<8x32xf32>
    %145 = vector.extract_strided_slice %140 {offsets = [0, 64], sizes = [8, 32], strides = [1, 1]} : vector<8x96xf32> to vector<8x32xf32>
    %146 = arith.mulf %144, %128 : vector<8x32xf32>
    %147 = arith.mulf %143, %142 : vector<8x32xf32>
    %148 = arith.addf %146, %147 : vector<8x32xf32>
    %149 = math.tanh %148 : vector<8x32xf32>
    %150 = arith.mulf %145, %149 : vector<8x32xf32>
    %151 = vector.extract_strided_slice %7 {offsets = [7, 0, 0], sizes = [1, 8, 128], strides = [1, 1, 1]} : vector<8x8x128xf32> to vector<1x8x128xf32>
    %152 = vector.shape_cast %151 : vector<1x8x128xf32> to vector<8x128xf32>
    %cst_24 = arith.constant dense<0.000000e+00> : vector<8x128xf32>
    %153 = tpu.matmul %150, %8, %cst_24 {dimension_numbers = #tpu.dot_dimension_numbers<[1], [0], [0], [1], [0, 0, 1, 1], [], []>} : vector<8x32xf32>, vector<32x128xf32>, vector<8x128xf32> -> vector<8x128xf32>
    %154 = arith.addf %152, %153 : vector<8x128xf32>
    %155 = vector.extract_strided_slice %154 {offsets = [0, 0], sizes = [8, 96], strides = [1, 1]} : vector<8x128xf32> to vector<8x96xf32>
    %156 = arith.negf %155 : vector<8x96xf32>
    %157 = math.exp %156 : vector<8x96xf32>
    %cst_25 = arith.constant 1.000000e+00 : f32
    %158 = vector.broadcast %cst_25 : f32 to vector<8x96xf32>
    %159 = arith.addf %158, %157 : vector<8x96xf32>
    %160 = arith.divf %158, %159 : vector<8x96xf32>
    %161 = vector.extract_strided_slice %154 {offsets = [0, 96], sizes = [8, 32], strides = [1, 1]} : vector<8x128xf32> to vector<8x32xf32>
    %162 = math.tanh %161 : vector<8x32xf32>
    %163 = vector.extract_strided_slice %160 {offsets = [0, 0], sizes = [8, 32], strides = [1, 1]} : vector<8x96xf32> to vector<8x32xf32>
    %164 = vector.extract_strided_slice %160 {offsets = [0, 32], sizes = [8, 32], strides = [1, 1]} : vector<8x96xf32> to vector<8x32xf32>
    %165 = vector.extract_strided_slice %160 {offsets = [0, 64], sizes = [8, 32], strides = [1, 1]} : vector<8x96xf32> to vector<8x32xf32>
    %166 = arith.mulf %164, %148 : vector<8x32xf32>
    %167 = arith.mulf %163, %162 : vector<8x32xf32>
    %168 = arith.addf %166, %167 : vector<8x32xf32>
    %169 = math.tanh %168 : vector<8x32xf32>
    %170 = arith.mulf %165, %169 : vector<8x32xf32>
    %cst_26 = arith.constant 0.000000e+00 : f32
    %171 = vector.broadcast %cst_26 : f32 to vector<8x32xf32>
    %172 = arith.maximumf %170, %171 : vector<8x32xf32>
    %c0_27 = arith.constant 0 : index
    %c0_28 = arith.constant 0 : index
    %173 = vector.load %arg5[%c0_27, %c0_28] : memref<1x32xf32, #tpu.memory_space<vmem>>, vector<1x32xf32>
    %174 = vector.broadcast %173 : vector<1x32xf32> to vector<8x32xf32>
    %175 = arith.mulf %172, %174 : vector<8x32xf32>
    %cst_29 = arith.constant dense<0.000000e+00> : vector<8xf32>
    %176 = vector.multi_reduction <add>, %175, %cst_29 [1] : vector<8x32xf32> to vector<8xf32>
    %177 = vector.shape_cast %176 : vector<8xf32> to vector<8x1xf32>
    %c0_30 = arith.constant 0 : index
    %c0_31 = arith.constant 0 : index
    %178 = vector.load %arg6[%c0_30, %c0_31] : memref<1x1xf32, #tpu.memory_space<vmem>>, vector<1x1xf32>
    %179 = vector.broadcast %178 : vector<1x1xf32> to vector<8x1xf32>
    %180 = arith.addf %177, %179 : vector<8x1xf32>
    %181 = arith.negf %180 : vector<8x1xf32>
    %182 = math.exp %181 : vector<8x1xf32>
    %cst_32 = arith.constant 1.000000e+00 : f32
    %183 = vector.broadcast %cst_32 : f32 to vector<8x1xf32>
    %184 = arith.addf %183, %182 : vector<8x1xf32>
    %185 = arith.divf %183, %184 : vector<8x1xf32>
    %c0_33 = arith.constant 0 : index
    %c0_34 = arith.constant 0 : index
    %186 = vector.load %arg7[%c0_33, %c0_34] : memref<8x1xf32, #tpu.memory_space<vmem>>, vector<8x1xf32>
    tpu.vector_store %arg7[%c0_33, %c0_34], %185 {strides = array<i32>} : memref<8x1xf32, #tpu.memory_space<vmem>>, vector<8x1xf32>,
    return
  }
  func.func @transform_0(%arg0: i32) -> (i32, i32, i32) {
    %c0_i32 = arith.constant 0 : i32
    %c0_i32_0 = arith.constant 0 : i32
    %c0_i32_1 = arith.constant 0 : i32
    %c0_i32_2 = arith.constant 0 : i32
    return %c0_i32, %c0_i32_0, %c0_i32_1 : i32, i32, i32
  }
  func.func @transform_1(%arg0: i32) -> (i32, i32) {
    %c0_i32 = arith.constant 0 : i32
    %c0_i32_0 = arith.constant 0 : i32
    %c0_i32_1 = arith.constant 0 : i32
    return %c0_i32, %c0_i32_0 : i32, i32
  }
  func.func @transform_2(%arg0: i32) -> (i32, i32) {
    %c0_i32 = arith.constant 0 : i32
    %c0_i32_0 = arith.constant 0 : i32
    %c0_i32_1 = arith.constant 0 : i32
    return %c0_i32, %c0_i32_0 : i32, i32
  }
  func.func @transform_3(%arg0: i32) -> (i32, i32) {
    %c0_i32 = arith.constant 0 : i32
    %c0_i32_0 = arith.constant 0 : i32
    %c0_i32_1 = arith.constant 0 : i32
    return %c0_i32, %c0_i32_0 : i32, i32
  }
  func.func @transform_4(%arg0: i32) -> (i32, i32) {
    %c0_i32 = arith.constant 0 : i32
    %c0_i32_0 = arith.constant 0 : i32
    %c0_i32_1 = arith.constant 0 : i32
    return %c0_i32, %c0_i32_0 : i32, i32
  }
  func.func @transform_5(%arg0: i32) -> (i32, i32) {
    %c0_i32 = arith.constant 0 : i32
    %c0_i32_0 = arith.constant 0 : i32
    %c0_i32_1 = arith.constant 0 : i32
    return %c0_i32, %c0_i32_0 : i32, i32
  }
  func.func @transform_6(%arg0: i32) -> (i32, i32) {
    %c0_i32 = arith.constant 0 : i32
    %c0_i32_0 = arith.constant 0 : i32
    %c0_i32_1 = arith.constant 0 : i32
    return %c0_i32, %c0_i32_0 : i32, i32
  }
}

</mosaic_0001>

<bundles_post_ra>
// kernel: tpu_custom_call.1
= control target key start
LH: loop header
LB: loop body
LE: loop exit
PB: predicated region body
PF: predicated region fallthrough
CT: control target
= control target key end

     0   :  { %vm66_vm0 = vcmask 1043456   ;;  %vm41_vm1 = vcmask 31744   ;;  %v1267_v0 = vmov 0.0   ;;  %vm1268_vm2 = vmmov 0   ;;  %s1269_s11 = smov 32   ;;  %s1517_s1 = inlined_call_operand.vmem [shape: f32[4,128], index: 1, kind: input, shape index: {}]   ;;  %s1518_s2 = inlined_call_operand.vmem [shape: f32[32,128], index: 2, kind: input, shape index: {}]   ;;  %s1519_s0 = inlined_call_operand.vmem [shape: f32[8,8,4], index: 0, kind: input, shape index: {}]   ;;  %s1520_s3 = inlined_call_operand.vmem [shape: f32[1,128], index: 3, kind: input, shape index: {}]   ;;  %s1521_s4 = inlined_call_operand.vmem [shape: f32[1,32], index: 4, kind: input, shape index: {}]   ;;  %s1522_s5 = inlined_call_operand.<no memory space> [shape: f32[1,1], index: 5, kind: input, shape index: {}]   ;;  %s1523_s6 = inlined_call_operand.vmem [shape: f32[8,1], index: 6, kind: output, shape index: {}]  }
   0x1   :  { %1107 = vmatprep.subr.mxu1 %v1267_v0  ;;  %v33_v1 = vld [vmem:[%s1517_s1] sm:$0xf]  ;;  %v1313_v2 = vld [vmem:[%s1518_s2 + $0x18] sm:$0xff]  ;;  %1115 = vmatprep.mubr.msk.f32.mxu1 %vm1268_vm2, %v1267_v0  ;;  %v26_v4 = vld [vmem:[%s1519_s0 + $0x8] sm:$0xff]  ;;  %vm179_vm3 = vcmask 261120   ;;  %vm1010_vm4 = vcmask 7168  }
   0x2   :  { %v25_v3 = vld [vmem:[%s1519_s0] sm:$0xff]  ;;  %1093 = vmatprep.subr.msk.mxu0 %vm66_vm0, %v33_v1  ;;  %1108 = vmatpush3.msra.mxu1 %v1313_v2  ;;  %v1327_v5 = vld [vmem:[%s1518_s2 + $0x10] sm:$0xff]  ;;  %v1335_v6 = vld [vmem:[%s1518_s2 + $0x8] sm:$0xff] }
   0x3   :  { %1094 = vmatpush3.msk.msra.mxu0 %vm66_vm0, %v33_v1  ;;  %1095 = vmatprep.mubr.msk.f32.mxu0 %vm41_vm1, %v25_v3  ;;  %v1343_v7 = vld [vmem:[%s1518_s2] sm:$0xff]  ;;  %v27_v43 = vld [vmem:[%s1519_s0 + $0x10] sm:$0xff]  ;;  %v28_v44 = vld [vmem:[%s1519_s0 + $0x18] sm:$0xff] }
   0x4   :  { %1109 = vmatprep.subr.mxu1 %v1267_v0  ;;  %1096 = vmatmul.mubr.msk.f32.vlgmr.msra.gmra.mxu0 %vm41_vm1, %v26_v4  ;;  %v1371_v9 = vld [vmem:[%s1520_s3] ss:$0 sm:$0xff]  ;;  %s1270_s3 = smov 64   ;;  %v30_v46 = vld [vmem:[%s1519_s0 + $0x28] sm:$0xff]  ;;  %v31_v47 = vld [vmem:[%s1519_s0 + $0x30] sm:$0xff] }
   0x5   :  { %1110 = vmatpush3.msra.mxu1 %v1327_v5  ;;  %1129 = vmatprep.subr.mxu0 %v1267_v0  ;;  %v29_v45 = vld [vmem:[%s1519_s0 + $0x20] sm:$0xff]  ;;  %v32_v48 = vld [vmem:[%s1519_s0 + $0x38] sm:$0xff] }
   0x6   :  { %1111 = vmatprep.subr.mxu1 %v1267_v0  ;;  %1130 = vmatpush3.msra.mxu0 %v1313_v2 }
   0x7   :  { %1112 = vmatpush3.msra.mxu1 %v1335_v6  ;;  %1131 = vmatprep.subr.mxu0 %v1267_v0 }
   0x8   :  { %1113 = vmatprep.subr.mxu1 %v1267_v0  ;;  %1132 = vmatpush3.msra.mxu0 %v1327_v5 }
   0x9   :  { %1114 = vmatpush3.msra.mxu1 %v1343_v7  ;;  %1133 = vmatprep.subr.mxu0 %v1267_v0 }
   0xa   :  { %1116 = vmatmul.mubr.f32.vlgmr.msra.gmra.mxu1 %v1267_v0  ;;  %1118 = vmatprep.subr.mxu1 %v1267_v0 }
   0xb   :  { %1119 = vmatpush3.msra.mxu1 %v1313_v2  ;;  %1126 = vmatprep.mubr.msk.f32.mxu1 %vm1268_vm2, %v1267_v0 }
   0xc   :  { %1120 = vmatprep.subr.mxu1 %v1267_v0  ;;  %1134 = vmatpush3.msra.mxu0 %v1335_v6 }
   0xd   :  { %1121 = vmatpush3.msra.mxu1 %v1327_v5  ;;  %1135 = vmatprep.subr.mxu0 %v1267_v0 }
   0xe   :  { %1122 = vmatprep.subr.mxu1 %v1267_v0  ;;  %1136 = vmatpush3.msra.mxu0 %v1343_v7 }
   0xf   :  { %1123 = vmatpush3.msra.mxu1 %v1335_v6  ;;  %1151 = vmatprep.subr.mxu0 %v1267_v0 }
  0x10   :  { %1124 = vmatprep.subr.mxu1 %v1267_v0  ;;  %1098 = vmatprep.mubr.msk.f32.mxu0 %vm41_vm1, %v27_v43 }
  0x11   :  { %1125 = vmatpush3.msra.mxu1 %v1343_v7  ;;  %1099 = vmatmul.mubr.msk.f32.gmra.mxu0 %vm41_vm1, %v28_v44 }
  0x12   :  { %1140 = vmatprep.subr.mxu1 %v1267_v0  ;;  %1101 = vmatprep.mubr.msk.f32.mxu0 %vm41_vm1, %v29_v45 }
  0x15   :  { %1102 = vmatmul.mubr.msk.f32.gmra.mxu0 %vm41_vm1, %v30_v46 }
  0x16   :  { %1104 = vmatprep.mubr.msk.f32.mxu0 %vm41_vm1, %v31_v47 }
  0x19   :  { %1105 = vmatmul.mubr.msk.f32.gmra.mxu0 %vm41_vm1, %v32_v48 }
  0x1a   :  { %1137 = vmatprep.mubr.msk.f32.mxu0 %vm1268_vm2, %v1267_v0 }
  0xc4   :  { %v1097_v8 = vpop.f32.mrf.mxu0 }
  0xc5   :  { %v142_v29 = vadd.f32 %v1097_v8, %v1371_v9 }
  0xc6   :  { %v136_v10 = vpop.f32.mrf.mxu0 }
  0xc7   :  { %v137_v11 = vadd.f32 %v1371_v9, %v136_v10 }
  0xca   :  { %v249_v12 = vpop.f32.mrf.mxu1 }
  0xcb   :  { %v253_v13 = vadd.f32 %v249_v12, %v137_v11 }
  0xcc   :  { %v1117_v14 = vpop.f32.mrf.mxu1 }
  0xcd   :  { %1199 = vtanh.f32 %v253_v13  ;;  %v1026_v16 = vmul.f32 -1.442695, %v253_v13 }
  0xcf   :  { %1201 = vpow2.f32 %v1026_v16 }
  0xd1   :  { %v1100_v53 = vpop.f32.mrf.mxu0 }
  0xd3   :  { %v146_v54 = vpop.f32.mrf.mxu0 }
  0xd4   :  { %v147_v59 = vadd.f32 %v1371_v9, %v146_v54 }
  0xd5   :  { %v1431_v55 = vpop.f32.mrf.mxu0 }
  0xd7   :  { %v1433_v56 = vpop.f32.mrf.mxu0 }
  0xd9   :  { %v1435_v57 = vpop.f32.mrf.mxu0 }
  0xda   :  { %v1200_v15 = vpop.eup %1199 }
  0xdb   :  { %263 = vrot.lane.b32.xlu0 %v1200_v15, %s1269_s11  ;;  %v1437_v58 = vpop.f32.mrf.mxu0 }
  0xdc   :  { %v1202_v17 = vpop.eup %1201 }
  0xdd   :  { %v257_v18 = vadd.f32 1.0, %v1202_v17 }
  0xdf   :  { %1203 = vrcp.f32 %v257_v18 }
  0xec   :  { %v1204_v19 = vpop.eup %1203 }
  0xed   :  { %v261_v22 = vmul.f32 0.0, %v1204_v19 }
 0x14d   :  { %v264_v20 = vpop.permute.xlu0 %263 }
 0x14e   :  { %v266_v21 = vmul.f32 %v1204_v19, %v264_v20 }
 0x150   :  { %268 = vrot.lane.b32.xlu0 %v266_v21, %s1269_s11 }
 0x1c2   :  { %v269_v23 = vpop.permute.xlu0 %268 }
 0x1c3   :  { %v271_v24 = vadd.f32 %v269_v23, %v261_v22 }
 0x1c5   :  { %1205 = vtanh.f32 %v271_v24 }
 0x1d2   :  { %v1206_v25 = vpop.eup %1205 }
 0x1d3   :  { %274 = vrot.lane.b32.xlu1 %v1206_v25, %s1269_s11 }
 0x245   :  { %v275_v26 = vpop.permute.xlu1 %274 }
 0x246   :  { %v277_v27 = vmul.f32 %v1204_v19, %v275_v26  ;;  %v152_v19 = vadd.f32 %v1100_v53, %v1371_v9 }
 0x248   :  { %279 = vrot.lane.b32.xlu1 %v277_v27, %s1270_s3 }
 0x2ba   :  { %v280_v28 = vpop.permute.xlu1 %279 }
 0x2bb   :  { %1127 = vmatmul.mubr.msk.f32.vlgmr.msra.gmra.mxu1 %vm179_vm3, %v280_v28 }
 0x2bc   :  { %1141 = vmatpush3.msra.mxu1 %v1313_v2  ;;  %1148 = vmatprep.mubr.msk.f32.mxu1 %vm1268_vm2, %v1267_v0 }
 0x2bd   :  { %1142 = vmatprep.subr.mxu1 %v1267_v0 }
 0x2be   :  { %1143 = vmatpush3.msra.mxu1 %v1327_v5 }
 0x2bf   :  { %1144 = vmatprep.subr.mxu1 %v1267_v0 }
 0x2c0   :  { %1145 = vmatpush3.msra.mxu1 %v1335_v6 }
 0x2c1   :  { %1146 = vmatprep.subr.mxu1 %v1267_v0 }
 0x2c2   :  { %1147 = vmatpush3.msra.mxu1 %v1343_v7 }
 0x2c3   :  { %1162 = vmatprep.subr.mxu1 %v1267_v0 }
 0x37b   :  { %v349_v30 = vpop.f32.mrf.mxu1 }
 0x37c   :  { %v353_v31 = vadd.f32 %v349_v30, %v142_v29 }
 0x37d   :  { %v1128_v32 = vpop.f32.mrf.mxu1 }
 0x37e   :  { %1207 = vtanh.f32 %v353_v31  ;;  %v1028_v34 = vmul.f32 -1.442695, %v353_v31 }
 0x380   :  { %1209 = vpow2.f32 %v1028_v34 }
 0x38b   :  { %v1208_v33 = vpop.eup %1207 }
 0x38c   :  { %363 = vrot.lane.b32.xlu0 %v1208_v33, %s1269_s11 }
 0x38d   :  { %v1210_v35 = vpop.eup %1209 }
 0x38e   :  { %v357_v36 = vadd.f32 1.0, %v1210_v35 }
 0x390   :  { %1211 = vrcp.f32 %v357_v36 }
 0x39d   :  { %v1212_v37 = vpop.eup %1211 }
 0x39e   :  { %v361_v40 = vmul.f32 %v1212_v37, %v271_v24 }
 0x3fe   :  { %v364_v38 = vpop.permute.xlu0 %363 }
 0x3ff   :  { %v366_v39 = vmul.f32 %v1212_v37, %v364_v38 }
 0x401   :  { %368 = vrot.lane.b32.xlu1 %v366_v39, %s1269_s11 }
 0x473   :  { %v369_v41 = vpop.permute.xlu1 %368 }
 0x474   :  { %v371_v42 = vadd.f32 %v369_v41, %v361_v40 }
 0x476   :  { %1213 = vtanh.f32 %v371_v42 }
 0x483   :  { %v1214_v49 = vpop.eup %1213 }
 0x484   :  { %374 = vrot.lane.b32.xlu0 %v1214_v49, %s1269_s11 }
 0x4f6   :  { %v375_v50 = vpop.permute.xlu0 %374 }
 0x4f7   :  { %v377_v51 = vmul.f32 %v1212_v37, %v375_v50  ;;  %v157_v37 = vadd.f32 %v1371_v9, %v1433_v56  ;;  %v162_v56 = vadd.f32 %v1431_v55, %v1371_v9 }
 0x4f9   :  { %379 = vrot.lane.b32.xlu1 %v377_v51, %s1270_s3 }
 0x56b   :  { %v380_v52 = vpop.permute.xlu1 %379 }
 0x56c   :  { %1138 = vmatmul.mubr.msk.f32.vlgmr.msra.gmra.mxu0 %vm179_vm3, %v380_v52 }
 0x56d   :  { %1152 = vmatpush3.msra.mxu0 %v1313_v2  ;;  %1159 = vmatprep.mubr.msk.f32.mxu0 %vm1268_vm2, %v1267_v0 }
 0x56e   :  { %1153 = vmatprep.subr.mxu0 %v1267_v0 }
 0x56f   :  { %1154 = vmatpush3.msra.mxu0 %v1327_v5 }
 0x570   :  { %1155 = vmatprep.subr.mxu0 %v1267_v0 }
 0x571   :  { %1156 = vmatpush3.msra.mxu0 %v1335_v6 }
 0x572   :  { %1157 = vmatprep.subr.mxu0 %v1267_v0 }
 0x573   :  { %1158 = vmatpush3.msra.mxu0 %v1343_v7 }
 0x574   :  { %1173 = vmatprep.subr.mxu0 %v1267_v0 }
 0x62c   :  { %v449_v60 = vpop.f32.mrf.mxu0 }
 0x62d   :  { %v453_v61 = vadd.f32 %v449_v60, %v147_v59 }
 0x62e   :  { %v1139_v62 = vpop.f32.mrf.mxu0 }
 0x62f   :  { %1215 = vtanh.f32 %v453_v61  ;;  %v1030_v1 = vmul.f32 -1.442695, %v453_v61 }
 0x631   :  { %1217 = vpow2.f32 %v1030_v1 }
 0x63c   :  { %v1216_v63 = vpop.eup %1215 }
 0x63d   :  { %463 = vrot.lane.b32.xlu0 %v1216_v63, %s1269_s11 }
 0x63e   :  { %v1218_v3 = vpop.eup %1217 }
 0x63f   :  { %v457_v4 = vadd.f32 1.0, %v1218_v3 }
 0x641   :  { %1219 = vrcp.f32 %v457_v4 }
 0x64e   :  { %v1220_v8 = vpop.eup %1219 }
 0x64f   :  { %v461_v12 = vmul.f32 %v1220_v8, %v371_v42 }
 0x6af   :  { %v464_v10 = vpop.permute.xlu0 %463 }
 0x6b0   :  { %v466_v11 = vmul.f32 %v1220_v8, %v464_v10 }
 0x6b2   :  { %468 = vrot.lane.b32.xlu1 %v466_v11, %s1269_s11 }
 0x724   :  { %v469_v13 = vpop.permute.xlu1 %468 }
 0x725   :  { %v471_v14 = vadd.f32 %v469_v13, %v461_v12  ;;  %v167_v12 = vadd.f32 %v1371_v9, %v1437_v58 }
 0x727   :  { %1221 = vtanh.f32 %v471_v14 }
 0x734   :  { %v1222_v15 = vpop.eup %1221 }
 0x735   :  { %474 = vrot.lane.b32.xlu0 %v1222_v15, %s1269_s11 }
 0x7a7   :  { %v475_v16 = vpop.permute.xlu0 %474 }
 0x7a8   :  { %v477_v17 = vmul.f32 %v1220_v8, %v475_v16 }
 0x7aa   :  { %479 = vrot.lane.b32.xlu1 %v477_v17, %s1270_s3 }
 0x81c   :  { %v480_v18 = vpop.permute.xlu1 %479 }
 0x81d   :  { %1149 = vmatmul.mubr.msk.f32.vlgmr.msra.gmra.mxu1 %vm179_vm3, %v480_v18 }
 0x81e   :  { %1163 = vmatpush3.msra.mxu1 %v1313_v2  ;;  %1170 = vmatprep.mubr.msk.f32.mxu1 %vm1268_vm2, %v1267_v0 }
 0x81f   :  { %1164 = vmatprep.subr.mxu1 %v1267_v0 }
 0x820   :  { %1165 = vmatpush3.msra.mxu1 %v1327_v5 }
 0x821   :  { %1166 = vmatprep.subr.mxu1 %v1267_v0 }
 0x822   :  { %1167 = vmatpush3.msra.mxu1 %v1335_v6 }
 0x823   :  { %1168 = vmatprep.subr.mxu1 %v1267_v0 }
 0x824   :  { %1169 = vmatpush3.msra.mxu1 %v1343_v7 }
 0x825   :  { %1184 = vmatprep.subr.mxu1 %v1267_v0 }
 0x8dd   :  { %v549_v20 = vpop.f32.mrf.mxu1 }
 0x8de   :  { %v553_v21 = vadd.f32 %v549_v20, %v152_v19 }
 0x8df   :  { %v1150_v22 = vpop.f32.mrf.mxu1 }
 0x8e0   :  { %1223 = vtanh.f32 %v553_v21  ;;  %v1032_v24 = vmul.f32 -1.442695, %v553_v21 }
 0x8e2   :  { %1225 = vpow2.f32 %v1032_v24 }
 0x8ed   :  { %v1224_v23 = vpop.eup %1223 }
 0x8ee   :  { %563 = vrot.lane.b32.xlu0 %v1224_v23, %s1269_s11 }
 0x8ef   :  { %v1226_v25 = vpop.eup %1225 }
 0x8f0   :  { %v557_v26 = vadd.f32 1.0, %v1226_v25 }
 0x8f2   :  { %1227 = vrcp.f32 %v557_v26 }
 0x8ff   :  { %v1228_v27 = vpop.eup %1227 }
 0x900   :  { %v561_v30 = vmul.f32 %v1228_v27, %v471_v14 }
 0x960   :  { %v564_v28 = vpop.permute.xlu0 %563 }
 0x961   :  { %v566_v29 = vmul.f32 %v1228_v27, %v564_v28 }
 0x963   :  { %568 = vrot.lane.b32.xlu1 %v566_v29, %s1269_s11  ;;  %v172_v29 = vadd.f32 %v1435_v57, %v1371_v9  ;;  %v1041_v9 = vld [vmem:[%s1521_s4] ss:$0 sm:$0xff] }
 0x9d5   :  { %v569_v31 = vpop.permute.xlu1 %568 }
 0x9d6   :  { %v571_v32 = vadd.f32 %v569_v31, %v561_v30 }
 0x9d8   :  { %1229 = vtanh.f32 %v571_v32 }
 0x9e5   :  { %v1230_v33 = vpop.eup %1229 }
 0x9e6   :  { %574 = vrot.lane.b32.xlu0 %v1230_v33, %s1269_s11 }
 0xa58   :  { %v575_v34 = vpop.permute.xlu0 %574 }
 0xa59   :  { %v577_v35 = vmul.f32 %v1228_v27, %v575_v34 }
 0xa5b   :  { %579 = vrot.lane.b32.xlu1 %v577_v35, %s1270_s3 }
 0xacd   :  { %v580_v36 = vpop.permute.xlu1 %579 }
 0xace   :  { %1160 = vmatmul.mubr.msk.f32.vlgmr.msra.gmra.mxu0 %vm179_vm3, %v580_v36 }
 0xacf   :  { %1174 = vmatpush3.msra.mxu0 %v1313_v2  ;;  %1181 = vmatprep.mubr.msk.f32.mxu0 %vm1268_vm2, %v1267_v0 }
 0xad0   :  { %1175 = vmatprep.subr.mxu0 %v1267_v0 }
 0xad1   :  { %1176 = vmatpush3.msra.mxu0 %v1327_v5 }
 0xad2   :  { %1177 = vmatprep.subr.mxu0 %v1267_v0 }
 0xad3   :  { %1178 = vmatpush3.msra.mxu0 %v1335_v6 }
 0xad4   :  { %1179 = vmatprep.subr.mxu0 %v1267_v0 }
 0xad5   :  { %1180 = vmatpush3.msra.mxu0 %v1343_v7 }
 0xb8e   :  { %v649_v38 = vpop.f32.mrf.mxu0 }
 0xb8f   :  { %v653_v39 = vadd.f32 %v649_v38, %v157_v37 }
 0xb90   :  { %v1161_v40 = vpop.f32.mrf.mxu0 }
 0xb91   :  { %1231 = vtanh.f32 %v653_v39  ;;  %v1034_v42 = vmul.f32 -1.442695, %v653_v39 }
 0xb93   :  { %1233 = vpow2.f32 %v1034_v42 }
 0xb9e   :  { %v1232_v41 = vpop.eup %1231 }
 0xb9f   :  { %663 = vrot.lane.b32.xlu0 %v1232_v41, %s1269_s11 }
 0xba0   :  { %v1234_v43 = vpop.eup %1233 }
 0xba1   :  { %v657_v44 = vadd.f32 1.0, %v1234_v43  ;;  %v11_v43 = vstv %s1522_s5 }
 0xba2   :  { %12 = vst [vmem:[#allocation2] sm:$0x1] %v11_v43 }
 0xba3   :  { %1235 = vrcp.f32 %v657_v44 }
 0xbb0   :  { %v1236_v45 = vpop.eup %1235 }
 0xbb1   :  { %v661_v48 = vmul.f32 %v1236_v45, %v571_v32 }
 0xc11   :  { %v664_v46 = vpop.permute.xlu0 %663 }
 0xc12   :  { %v666_v47 = vmul.f32 %v1236_v45, %v664_v46 }
 0xc14   :  { %668 = vrot.lane.b32.xlu1 %v666_v47, %s1269_s11 }
 0xc86   :  { %v669_v49 = vpop.permute.xlu1 %668 }
 0xc87   :  { %v671_v50 = vadd.f32 %v669_v49, %v661_v48 }
 0xc89   :  { %1237 = vtanh.f32 %v671_v50 }
 0xc96   :  { %v1238_v51 = vpop.eup %1237 }
 0xc97   :  { %674 = vrot.lane.b32.xlu0 %v1238_v51, %s1269_s11  ;;  %v1042_v51 = vld [vmem:[#allocation2] ss:$0 sm:$0xff] }
 0xd09   :  { %v675_v52 = vpop.permute.xlu0 %674 }
 0xd0a   :  { %v677_v53 = vmul.f32 %v1236_v45, %v675_v52 }
 0xd0c   :  { %679 = vrot.lane.b32.xlu1 %v677_v53, %s1270_s3 }
 0xd7e   :  { %v680_v54 = vpop.permute.xlu1 %679 }
 0xd7f   :  { %1171 = vmatmul.mubr.msk.f32.vlgmr.msra.gmra.mxu1 %vm179_vm3, %v680_v54 }
 0xd80   :  { %1185 = vmatpush3.msra.mxu1 %v1313_v2  ;;  %1192 = vmatprep.mubr.msk.f32.mxu1 %vm1268_vm2, %v1267_v0 }
 0xd81   :  { %1186 = vmatprep.subr.mxu1 %v1267_v0 }
 0xd82   :  { %1187 = vmatpush3.msra.mxu1 %v1327_v5 }
 0xd83   :  { %1188 = vmatprep.subr.mxu1 %v1267_v0 }
 0xd84   :  { %1189 = vmatpush3.msra.mxu1 %v1335_v6 }
 0xd85   :  { %1190 = vmatprep.subr.mxu1 %v1267_v0 }
 0xd86   :  { %1191 = vmatpush3.msra.mxu1 %v1343_v7 }
 0xe3f   :  { %v749_v59 = vpop.f32.mrf.mxu1 }
 0xe40   :  { %v753_v2 = vadd.f32 %v749_v59, %v162_v56 }
 0xe41   :  { %v1172_v60 = vpop.f32.mrf.mxu1 }
 0xe42   :  { %1239 = vtanh.f32 %v753_v2  ;;  %v1036_v62 = vmul.f32 -1.442695, %v753_v2 }
 0xe44   :  { %1241 = vpow2.f32 %v1036_v62 }
 0xe4f   :  { %v1240_v61 = vpop.eup %1239 }
 0xe50   :  { %763 = vrot.lane.b32.xlu0 %v1240_v61, %s1269_s11 }
 0xe51   :  { %v1242_v5 = vpop.eup %1241 }
 0xe52   :  { %v757_v63 = vadd.f32 1.0, %v1242_v5 }
 0xe54   :  { %1243 = vrcp.f32 %v757_v63 }
 0xe61   :  { %v1244_v6 = vpop.eup %1243 }
 0xe62   :  { %v761_v7 = vmul.f32 %v1244_v6, %v671_v50 }
 0xec2   :  { %v764_v1 = vpop.permute.xlu0 %763 }
 0xec3   :  { %v766_v0 = vmul.f32 %v1244_v6, %v764_v1 }
 0xec5   :  { %768 = vrot.lane.b32.xlu1 %v766_v0, %s1269_s11 }
 0xf37   :  { %v769_v3 = vpop.permute.xlu1 %768 }
 0xf38   :  { %v771_v55 = vadd.f32 %v769_v3, %v761_v7 }
 0xf3a   :  { %1245 = vtanh.f32 %v771_v55 }
 0xf47   :  { %v1246_v4 = vpop.eup %1245 }
 0xf48   :  { %774 = vrot.lane.b32.xlu0 %v1246_v4, %s1269_s11 }
 0xfba   :  { %v775_v8 = vpop.permute.xlu0 %774 }
 0xfbb   :  { %v777_v10 = vmul.f32 %v1244_v6, %v775_v8 }
 0xfbd   :  { %779 = vrot.lane.b32.xlu1 %v777_v10, %s1270_s3 }
0x102f   :  { %v780_v11 = vpop.permute.xlu1 %779 }
0x1030   :  { %1182 = vmatmul.mubr.msk.f32.vlgmr.msra.gmra.mxu0 %vm179_vm3, %v780_v11 }
0x10f0   :  { %v849_v13 = vpop.f32.mrf.mxu0 }
0x10f1   :  { %v853_v14 = vadd.f32 %v849_v13, %v167_v12 }
0x10f2   :  { %v1183_v15 = vpop.f32.mrf.mxu0 }
0x10f3   :  { %1247 = vtanh.f32 %v853_v14  ;;  %v1038_v17 = vmul.f32 -1.442695, %v853_v14 }
0x10f5   :  { %1249 = vpow2.f32 %v1038_v17 }
0x1100   :  { %v1248_v16 = vpop.eup %1247 }
0x1101   :  { %863 = vrot.lane.b32.xlu0 %v1248_v16, %s1269_s11 }
0x1102   :  { %v1250_v18 = vpop.eup %1249 }
0x1103   :  { %v857_v19 = vadd.f32 1.0, %v1250_v18 }
0x1105   :  { %1251 = vrcp.f32 %v857_v19 }
0x1112   :  { %v1252_v20 = vpop.eup %1251 }
0x1113   :  { %v861_v23 = vmul.f32 %v1252_v20, %v771_v55 }
0x1173   :  { %v864_v21 = vpop.permute.xlu0 %863 }
0x1174   :  { %v866_v22 = vmul.f32 %v1252_v20, %v864_v21 }
0x1176   :  { %868 = vrot.lane.b32.xlu1 %v866_v22, %s1269_s11 }
0x11e8   :  { %v869_v24 = vpop.permute.xlu1 %868 }
0x11e9   :  { %v871_v58 = vadd.f32 %v869_v24, %v861_v23 }
0x11eb   :  { %1253 = vtanh.f32 %v871_v58 }
0x11f8   :  { %v1254_v25 = vpop.eup %1253 }
0x11f9   :  { %874 = vrot.lane.b32.xlu0 %v1254_v25, %s1269_s11 }
0x126b   :  { %v875_v26 = vpop.permute.xlu0 %874 }
0x126c   :  { %v877_v27 = vmul.f32 %v1252_v20, %v875_v26 }
0x126e   :  { %879 = vrot.lane.b32.xlu1 %v877_v27, %s1270_s3 }
0x12e0   :  { %v880_v28 = vpop.permute.xlu1 %879 }
0x12e1   :  { %1193 = vmatmul.mubr.msk.f32.vlgmr.msra.gmra.mxu1 %vm179_vm3, %v880_v28 }
0x13a1   :  { %v949_v30 = vpop.f32.mrf.mxu1 }
0x13a2   :  { %v953_v31 = vadd.f32 %v949_v30, %v172_v29 }
0x13a3   :  { %v1194_v32 = vpop.f32.mrf.mxu1 }
0x13a4   :  { %1255 = vtanh.f32 %v953_v31  ;;  %v1040_v34 = vmul.f32 -1.442695, %v953_v31 }
0x13a6   :  { %1257 = vpow2.f32 %v1040_v34 }
0x13b1   :  { %v1256_v33 = vpop.eup %1255 }
0x13b2   :  { %963 = vrot.lane.b32.xlu0 %v1256_v33, %s1269_s11 }
0x13b3   :  { %v1258_v35 = vpop.eup %1257 }
0x13b4   :  { %v957_v36 = vadd.f32 1.0, %v1258_v35 }
0x13b6   :  { %1259 = vrcp.f32 %v957_v36 }
0x13c3   :  { %v1260_v37 = vpop.eup %1259 }
0x13c4   :  { %v961_v57 = vmul.f32 %v1260_v37, %v871_v58 }
0x1424   :  { %v964_v38 = vpop.permute.xlu0 %963 }
0x1425   :  { %v966_v39 = vmul.f32 %v1260_v37, %v964_v38 }
0x1427   :  { %968 = vrot.lane.b32.xlu1 %v966_v39, %s1269_s11 }
0x142b   :  { %985 = vrot.lane.b32.xlu1 %v1041_v9, %s1270_s3 }
0x1499   :  { %v969_v40 = vpop.permute.xlu1 %968 }
0x149a   :  { %v971_v41 = vadd.f32 %v969_v40, %v961_v57 }
0x149c   :  { %1261 = vtanh.f32 %v971_v41 }
0x149d   :  { %v986_v46 = vpop.permute.xlu1 %985 }
0x14a9   :  { %v1262_v42 = vpop.eup %1261 }
0x14aa   :  { %974 = vrot.lane.b32.xlu0 %v1262_v42, %s1269_s11 }
0x151c   :  { %v975_v44 = vpop.permute.xlu0 %974 }
0x151d   :  { %v977_v45 = vmul.f32 %v1260_v37, %v975_v44 }
0x151f   :  { %v978_v47 = vmax.f32 %v977_v45, 0.0 }
0x1521   :  { %v988_v48 = vmul.f32 %v986_v46, %v978_v47 }
0x1523   :  { %990 = vrot.lane.b32.xlu0 %v988_v48, %s1270_s3 }
0x1595   :  { %v991_v49 = vpop.permute.xlu0 %990 }
0x1596   :  { %v993_v50 = vsel %vm179_vm3, %v991_v49, 0.0 }
0x1597   :  { %994 = vadd.xlane.f32.xlu1 %v993_v50 }
0x1620   :  { %v995_v52 = vpop.xlane.xlu1 %994 }
0x1621   :  { %v1003_v53 = vadd.f32 %v1042_v51, %v995_v52 }
0x1623   :  { %v1043_v54 = vmul.f32 -1.442695, %v1003_v53 }
0x1625   :  { %1263 = vpow2.f32 %v1043_v54 }
0x1632   :  { %v1264_v56 = vpop.eup %1263 }
0x1633   :  { %v1007_v59 = vadd.f32 1.0, %v1264_v56 }
0x1635   :  { %1265 = vrcp.f32 %v1007_v59 }
0x1642   :  { %v1266_v2 = vpop.eup %1265 }
0x1643   :  { %1011 = vst.msk [vmem:[%s1523_s6] sm:$0xff] %vm1010_vm4, %v1266_v2 }

</bundles_post_ra>
